<compile_context>
chip_gen: v7x
topology: tpu7x:2x2x1
jax: 0.10.0
libtpu: 0.0.40
codegen_flags: <defaults>
</compile_context>

<pallas_src>
import functools

import jax
import jax.numpy as jnp
from jax.experimental import pallas as pl
from jax.experimental.pallas import tpu as pltpu


# ---------------------------------------------------------------------------
# series_decomp: moving-average (replicate-padded) trend decomposition.
# Operates on a 2-D slab x2d [S, M]   (S = seq_len on sublanes, M = B*N on lanes).
# ---------------------------------------------------------------------------
def _decomp_kernel(x_ref, res_ref, mean_ref, xpad_ref, *, kernel_size, pad):
    """x_ref / res_ref / mean_ref: (S, Mb);  xpad_ref scratch: (S + 2*pad, Mb)."""
    S, Mb = x_ref.shape
    xv = x_ref[...]                                   # single read of the tile

    # Build the edge-replicated padded slab in VMEM (never materialized in HBM).
    xpad_ref[pl.ds(pad, S), :] = xv
    xpad_ref[pl.ds(0, pad), :] = jnp.broadcast_to(xv[0:1, :], (pad, Mb))
    xpad_ref[pl.ds(pad + S, pad), :] = jnp.broadcast_to(xv[S - 1:S, :], (pad, Mb))

    # Sliding-window sum as kernel_size shifted adds (kernel_size is small/static),
    # accumulated in f32.
    acc = jnp.zeros((S, Mb), jnp.float32)
    for i in range(kernel_size):
        acc = acc + xpad_ref[pl.ds(i, S), :].astype(jnp.float32)
    mean = acc * (1.0 / kernel_size)

    mean_ref[...] = mean.astype(mean_ref.dtype)
    res_ref[...] = (xv.astype(jnp.float32) - mean).astype(res_ref.dtype)


def series_decomp_2d(x2d, kernel_size, *, block_m=512):
    """x2d: [S, M] (time, batch*features). Returns (res, moving_mean), both [S, M]."""
    assert kernel_size % 2 == 1, "kernel_size must be odd for same-length output"
    S, M = x2d.shape
    pad = (kernel_size - 1) // 2
    # Full lane axis if small, otherwise 512-lane tiles (multiple of 128).
    Mb = M if M <= block_m else block_m
    grid = (pl.cdiv(M, Mb),)

    kernel = functools.partial(_decomp_kernel, kernel_size=kernel_size, pad=pad)
    res, mean = pl.pallas_call(
        kernel,
        out_shape=(
            jax.ShapeDtypeStruct((S, M), x2d.dtype),
            jax.ShapeDtypeStruct((S, M), x2d.dtype),
        ),
        grid_spec=pltpu.PrefetchScalarGridSpec(
            num_scalar_prefetch=0,
            grid=grid,
            in_specs=[pl.BlockSpec((S, Mb), lambda j: (0, j))],
            out_specs=[
                pl.BlockSpec((S, Mb), lambda j: (0, j)),
                pl.BlockSpec((S, Mb), lambda j: (0, j)),
            ],
            scratch_shapes=[pltpu.VMEM((S + 2 * pad, Mb), x2d.dtype)],
        ),
        compiler_params=pltpu.CompilerParams(
            dimension_semantics=("parallel",)),
    )(x2d)
    return res, mean


# ---------------------------------------------------------------------------
# MLP layers:  h = sigmoid(W @ v + b)   on [D, M] = [D, K] @ [K, M] slabs.
# ---------------------------------------------------------------------------
def _sigmoid(h):
    # Explicit exp-based sigmoid (EUP) to keep the lowering simple.
    return 1.0 / (1.0 + jnp.exp(-h))


def _lin_sig_kernel(w_ref, b_ref, v_ref, o_ref):
    h = jnp.dot(w_ref[...], v_ref[...], preferred_element_type=jnp.float32)
    h = h + b_ref[...].astype(jnp.float32)
    o_ref[...] = _sigmoid(h).astype(o_ref.dtype)


def _lin_sig_add_kernel(w_ref, b_ref, t_ref, r_ref, o_ref):
    # Last MLP layer fused with the final `mlp(t) + mlp(r)` add.
    w = w_ref[...]
    b = b_ref[...].astype(jnp.float32)
    ht = jnp.dot(w, t_ref[...], preferred_element_type=jnp.float32) + b
    hr = jnp.dot(w, r_ref[...], preferred_element_type=jnp.float32) + b
    o_ref[...] = (_sigmoid(ht) + _sigmoid(hr)).astype(o_ref.dtype)


def _lin_grid(M, block_m):
    Mb = M if M <= block_m else block_m
    return Mb, (pl.cdiv(M, Mb),)


def linear_sigmoid(w, b, v, *, block_m=512):
    """sigmoid(w @ v + b):  w [D, K], b [D], v [K, M]  ->  [D, M]."""
    D, K = w.shape
    Kv, M = v.shape
    assert Kv == K
    Mb, grid = _lin_grid(M, block_m)
    return pl.pallas_call(
        _lin_sig_kernel,
        out_shape=jax.ShapeDtypeStruct((D, M), v.dtype),
        grid_spec=pltpu.PrefetchScalarGridSpec(
            num_scalar_prefetch=0,
            grid=grid,
            in_specs=[
                pl.BlockSpec((D, K), lambda j: (0, 0)),   # weights: constant block
                pl.BlockSpec((D, 1), lambda j: (0, 0)),   # bias
                pl.BlockSpec((K, Mb), lambda j: (0, j)),  # activations
            ],
            out_specs=pl.BlockSpec((D, Mb), lambda j: (0, j)),
        ),
        compiler_params=pltpu.CompilerParams(
            dimension_semantics=("parallel",)),
    )(w, b.reshape(D, 1), v)


def linear_sigmoid_add(w, b, t, r, *, block_m=512):
    """sigmoid(w @ t + b) + sigmoid(w @ r + b):  fused last layer + branch add."""
    D, K = w.shape
    Kt, M = t.shape
    assert Kt == K and r.shape == t.shape
    Mb, grid = _lin_grid(M, block_m)
    return pl.pallas_call(
        _lin_sig_add_kernel,
        out_shape=jax.ShapeDtypeStruct((D, M), t.dtype),
        grid_spec=pltpu.PrefetchScalarGridSpec(
            num_scalar_prefetch=0,
            grid=grid,
            in_specs=[
                pl.BlockSpec((D, K), lambda j: (0, 0)),
                pl.BlockSpec((D, 1), lambda j: (0, 0)),
                pl.BlockSpec((K, Mb), lambda j: (0, j)),
                pl.BlockSpec((K, Mb), lambda j: (0, j)),
            ],
            out_specs=pl.BlockSpec((D, Mb), lambda j: (0, j)),
        ),
        compiler_params=pltpu.CompilerParams(
            dimension_semantics=("parallel",)),
    )(w, b.reshape(D, 1), t, r)


# ---------------------------------------------------------------------------
# Full ST_layer forward.
# ---------------------------------------------------------------------------
def st_layer_forward(x, mlp_layers, *, decomp_size):
    """x: [B, S, N]  ->  [B, d_model, N].

    mlp_layers: list of (w, b); first w is [d_model, S], the rest [d_model, d_model].
    The same weights are applied to both decomposition branches (as in PyTorch,
    ST_layer reuses self.mlp for t and r).
    NOTE: ST_layer also builds a Conv_out sub-module but never uses it in forward.
    """
    B, S, N = x.shape
    M = B * N
    # One layout transpose up front (the PyTorch MLP does 'b s n -> b n s' anyway);
    # everything downstream works on lane-dense [*, B*N] slabs.
    x2d = jnp.transpose(x, (1, 0, 2)).reshape(S, M)            # [S, B*N]

    t2d, r2d = series_decomp_2d(x2d, decomp_size)              # (res, moving_mean)

    t, r = t2d, r2d
    for (w, b) in mlp_layers[:-1]:
        t = linear_sigmoid(w, b, t)
        r = linear_sigmoid(w, b, r)
    w, b = mlp_layers[-1]
    out2d = linear_sigmoid_add(w, b, t, r)                      # [D, B*N]

    D = out2d.shape[0]
    return out2d.reshape(D, B, N).transpose(1, 0, 2)            # [B, D, N]


# ---------------------------------------------------------------------------
# Pure-JAX reference mirroring the PyTorch forward exactly.
# ---------------------------------------------------------------------------
def _reference(x, mlp_layers, decomp_size):
    pad = (decomp_size - 1) // 2
    front = jnp.repeat(x[:, 0:1, :], pad, axis=1)
    end = jnp.repeat(x[:, -1:, :], pad, axis=1)
    xp = jnp.concatenate([front, x, end], axis=1)
    S = x.shape[1]
    windows = jnp.stack([xp[:, i:i + S, :] for i in range(decomp_size)], axis=0)
    mean = jnp.mean(windows, axis=0)
    res = x - mean

    def mlp(v):                                    # v: [B, S, N]
        h = jnp.transpose(v, (0, 2, 1))            # [B, N, S]
        for (w, b) in mlp_layers:
            h = jax.nn.sigmoid(
                jnp.einsum('bnk,dk->bnd', h, w,
                           precision=jax.lax.Precision.HIGHEST) + b)
        return jnp.transpose(h, (0, 2, 1))         # [B, D, N]

    return mlp(res) + mlp(mean), res, mean


if __name__ == "__main__":
    # Small shapes consistent with ST_layer(seq_len, d_model, layer_num, fea_dim, ...).
    B, seq_len, fea_dim = 4, 32, 32          # x: [batch, seq_len, fea_dim]  (B*N = 128 lanes)
    d_model, layer_num = 32, 3
    decomp_size = 25                         # module default

    key = jax.random.PRNGKey(0)
    keys = jax.random.split(key, 1 + 2 * layer_num)
    x = jax.random.normal(keys[0], (B, seq_len, fea_dim), dtype=jnp.float32)

    mlp_layers = []
    in_dim = seq_len
    for i in range(layer_num):
        w = jax.random.normal(keys[1 + 2 * i], (d_model, in_dim), jnp.float32) / jnp.sqrt(in_dim)
        b = jax.random.normal(keys[2 + 2 * i], (d_model,), jnp.float32) * 0.1
        mlp_layers.append((w, b))
        in_dim = d_model

    # Run the full Pallas forward.
    out = st_layer_forward(x, mlp_layers, decomp_size=decomp_size)
    out = jax.block_until_ready(out)

    # Reference + standalone check of the decomposition kernel.
    out_ref, res_ref, mean_ref = _reference(x, mlp_layers, decomp_size)

    x2d = jnp.transpose(x, (1, 0, 2)).reshape(seq_len, B * fea_dim)
    res2d, mean2d = series_decomp_2d(x2d, decomp_size)
    res2d = jax.block_until_ready(res2d)
    res_chk = res2d.reshape(seq_len, B, fea_dim).transpose(1, 0, 2)
    mean_chk = mean2d.reshape(seq_len, B, fea_dim).transpose(1, 0, 2)

    assert out.shape == (B, d_model, fea_dim)
    assert jnp.allclose(res_chk, res_ref, atol=1e-5, rtol=1e-5)
    assert jnp.allclose(mean_chk, mean_ref, atol=1e-5, rtol=1e-5)
    assert jnp.allclose(out, out_ref, atol=1e-3, rtol=1e-3)

    print("KERNEL_OK")
</pallas_src>

<mosaic_0001>
module attributes {stable_mosaic.version = 11 : i64} {
  func.func @_decomp_kernel(%arg0: i32, %arg1: memref<32x128xf32, #tpu.memory_space<vmem>>, %arg2: memref<32x128xf32, #tpu.memory_space<vmem>>, %arg3: memref<32x128xf32, #tpu.memory_space<vmem>>, %arg4: memref<56x128xf32, #tpu.memory_space<vmem>>) attributes {dimension_semantics = [#tpu.dimension_semantics<parallel>], iteration_bounds = array<i64: 1>, scalar_prefetch = 0 : i64, scratch_operands = 1 : i64, tpu.core_type = #tpu.core_type<tc>, window_params = [{transform_indices = @transform_0, window_bounds = array<i64: 32, 128>}, {transform_indices = @transform_1, window_bounds = array<i64: 32, 128>}, {transform_indices = @transform_2, window_bounds = array<i64: 32, 128>}]} {
    %c0 = arith.constant 0 : index
    %c0_0 = arith.constant 0 : index
    %0 = vector.load %arg1[%c0, %c0_0] : memref<32x128xf32, #tpu.memory_space<vmem>>, vector<32x128xf32>
    %c12 = arith.constant 12 : index
    %c0_1 = arith.constant 0 : index
    %1 = vector.load %arg4[%c12, %c0_1] : memref<56x128xf32, #tpu.memory_space<vmem>>, vector<32x128xf32>
    tpu.vector_store %arg4[%c12, %c0_1], %0 {strides = array<i32>} : memref<56x128xf32, #tpu.memory_space<vmem>>, vector<32x128xf32>,
    %2 = vector.extract_strided_slice %0 {offsets = [0, 0], sizes = [1, 128], strides = [1, 1]} : vector<32x128xf32> to vector<1x128xf32>
    %3 = vector.shape_cast %2 : vector<1x128xf32> to vector<1x128xf32>
    %4 = vector.broadcast %3 : vector<1x128xf32> to vector<12x128xf32>
    %c0_2 = arith.constant 0 : index
    %c0_3 = arith.constant 0 : index
    %5 = vector.load %arg4[%c0_2, %c0_3] : memref<56x128xf32, #tpu.memory_space<vmem>>, vector<12x128xf32>
    tpu.vector_store %arg4[%c0_2, %c0_3], %4 {strides = array<i32>} : memref<56x128xf32, #tpu.memory_space<vmem>>, vector<12x128xf32>,
    %6 = vector.extract_strided_slice %0 {offsets = [31, 0], sizes = [1, 128], strides = [1, 1]} : vector<32x128xf32> to vector<1x128xf32>
    %7 = vector.shape_cast %6 : vector<1x128xf32> to vector<1x128xf32>
    %8 = vector.broadcast %7 : vector<1x128xf32> to vector<12x128xf32>
    %c44 = arith.constant 44 : index
    %c0_4 = arith.constant 0 : index
    %9 = vector.load %arg4[%c44, %c0_4] : memref<56x128xf32, #tpu.memory_space<vmem>>, vector<12x128xf32>
    tpu.vector_store %arg4[%c44, %c0_4], %8 {strides = array<i32>} : memref<56x128xf32, #tpu.memory_space<vmem>>, vector<12x128xf32>,
    %cst = arith.constant 0.000000e+00 : f32
    %10 = vector.broadcast %cst : f32 to vector<32x128xf32>
    %c0_5 = arith.constant 0 : index
    %c0_6 = arith.constant 0 : index
    %11 = vector.load %arg4[%c0_5, %c0_6] : memref<56x128xf32, #tpu.memory_space<vmem>>, vector<32x128xf32>
    %12 = arith.addf %10, %11 : vector<32x128xf32>
    %c1 = arith.constant 1 : index
    %c0_7 = arith.constant 0 : index
    %13 = vector.load %arg4[%c1, %c0_7] : memref<56x128xf32, #tpu.memory_space<vmem>>, vector<32x128xf32>
    %14 = arith.addf %12, %13 : vector<32x128xf32>
    %c2 = arith.constant 2 : index
    %c0_8 = arith.constant 0 : index
    %15 = vector.load %arg4[%c2, %c0_8] : memref<56x128xf32, #tpu.memory_space<vmem>>, vector<32x128xf32>
    %16 = arith.addf %14, %15 : vector<32x128xf32>
    %c3 = arith.constant 3 : index
    %c0_9 = arith.constant 0 : index
    %17 = vector.load %arg4[%c3, %c0_9] : memref<56x128xf32, #tpu.memory_space<vmem>>, vector<32x128xf32>
    %18 = arith.addf %16, %17 : vector<32x128xf32>
    %c4 = arith.constant 4 : index
    %c0_10 = arith.constant 0 : index
    %19 = vector.load %arg4[%c4, %c0_10] : memref<56x128xf32, #tpu.memory_space<vmem>>, vector<32x128xf32>
    %20 = arith.addf %18, %19 : vector<32x128xf32>
    %c5 = arith.constant 5 : index
    %c0_11 = arith.constant 0 : index
    %21 = vector.load %arg4[%c5, %c0_11] : memref<56x128xf32, #tpu.memory_space<vmem>>, vector<32x128xf32>
    %22 = arith.addf %20, %21 : vector<32x128xf32>
    %c6 = arith.constant 6 : index
    %c0_12 = arith.constant 0 : index
    %23 = vector.load %arg4[%c6, %c0_12] : memref<56x128xf32, #tpu.memory_space<vmem>>, vector<32x128xf32>
    %24 = arith.addf %22, %23 : vector<32x128xf32>
    %c7 = arith.constant 7 : index
    %c0_13 = arith.constant 0 : index
    %25 = vector.load %arg4[%c7, %c0_13] : memref<56x128xf32, #tpu.memory_space<vmem>>, vector<32x128xf32>
    %26 = arith.addf %24, %25 : vector<32x128xf32>
    %c8 = arith.constant 8 : index
    %c0_14 = arith.constant 0 : index
    %27 = vector.load %arg4[%c8, %c0_14] : memref<56x128xf32, #tpu.memory_space<vmem>>, vector<32x128xf32>
    %28 = arith.addf %26, %27 : vector<32x128xf32>
    %c9 = arith.constant 9 : index
    %c0_15 = arith.constant 0 : index
    %29 = vector.load %arg4[%c9, %c0_15] : memref<56x128xf32, #tpu.memory_space<vmem>>, vector<32x128xf32>
    %30 = arith.addf %28, %29 : vector<32x128xf32>
    %c10 = arith.constant 10 : index
    %c0_16 = arith.constant 0 : index
    %31 = vector.load %arg4[%c10, %c0_16] : memref<56x128xf32, #tpu.memory_space<vmem>>, vector<32x128xf32>
    %32 = arith.addf %30, %31 : vector<32x128xf32>
    %c11 = arith.constant 11 : index
    %c0_17 = arith.constant 0 : index
    %33 = vector.load %arg4[%c11, %c0_17] : memref<56x128xf32, #tpu.memory_space<vmem>>, vector<32x128xf32>
    %34 = arith.addf %32, %33 : vector<32x128xf32>
    %c12_18 = arith.constant 12 : index
    %c0_19 = arith.constant 0 : index
    %35 = vector.load %arg4[%c12_18, %c0_19] : memref<56x128xf32, #tpu.memory_space<vmem>>, vector<32x128xf32>
    %36 = arith.addf %34, %35 : vector<32x128xf32>
    %c13 = arith.constant 13 : index
    %c0_20 = arith.constant 0 : index
    %37 = vector.load %arg4[%c13, %c0_20] : memref<56x128xf32, #tpu.memory_space<vmem>>, vector<32x128xf32>
    %38 = arith.addf %36, %37 : vector<32x128xf32>
    %c14 = arith.constant 14 : index
    %c0_21 = arith.constant 0 : index
    %39 = vector.load %arg4[%c14, %c0_21] : memref<56x128xf32, #tpu.memory_space<vmem>>, vector<32x128xf32>
    %40 = arith.addf %38, %39 : vector<32x128xf32>
    %c15 = arith.constant 15 : index
    %c0_22 = arith.constant 0 : index
    %41 = vector.load %arg4[%c15, %c0_22] : memref<56x128xf32, #tpu.memory_space<vmem>>, vector<32x128xf32>
    %42 = arith.addf %40, %41 : vector<32x128xf32>
    %c16 = arith.constant 16 : index
    %c0_23 = arith.constant 0 : index
    %43 = vector.load %arg4[%c16, %c0_23] : memref<56x128xf32, #tpu.memory_space<vmem>>, vector<32x128xf32>
    %44 = arith.addf %42, %43 : vector<32x128xf32>
    %c17 = arith.constant 17 : index
    %c0_24 = arith.constant 0 : index
    %45 = vector.load %arg4[%c17, %c0_24] : memref<56x128xf32, #tpu.memory_space<vmem>>, vector<32x128xf32>
    %46 = arith.addf %44, %45 : vector<32x128xf32>
    %c18 = arith.constant 18 : index
    %c0_25 = arith.constant 0 : index
    %47 = vector.load %arg4[%c18, %c0_25] : memref<56x128xf32, #tpu.memory_space<vmem>>, vector<32x128xf32>
    %48 = arith.addf %46, %47 : vector<32x128xf32>
    %c19 = arith.constant 19 : index
    %c0_26 = arith.constant 0 : index
    %49 = vector.load %arg4[%c19, %c0_26] : memref<56x128xf32, #tpu.memory_space<vmem>>, vector<32x128xf32>
    %50 = arith.addf %48, %49 : vector<32x128xf32>
    %c20 = arith.constant 20 : index
    %c0_27 = arith.constant 0 : index
    %51 = vector.load %arg4[%c20, %c0_27] : memref<56x128xf32, #tpu.memory_space<vmem>>, vector<32x128xf32>
    %52 = arith.addf %50, %51 : vector<32x128xf32>
    %c21 = arith.constant 21 : index
    %c0_28 = arith.constant 0 : index
    %53 = vector.load %arg4[%c21, %c0_28] : memref<56x128xf32, #tpu.memory_space<vmem>>, vector<32x128xf32>
    %54 = arith.addf %52, %53 : vector<32x128xf32>
    %c22 = arith.constant 22 : index
    %c0_29 = arith.constant 0 : index
    %55 = vector.load %arg4[%c22, %c0_29] : memref<56x128xf32, #tpu.memory_space<vmem>>, vector<32x128xf32>
    %56 = arith.addf %54, %55 : vector<32x128xf32>
    %c23 = arith.constant 23 : index
    %c0_30 = arith.constant 0 : index
    %57 = vector.load %arg4[%c23, %c0_30] : memref<56x128xf32, #tpu.memory_space<vmem>>, vector<32x128xf32>
    %58 = arith.addf %56, %57 : vector<32x128xf32>
    %c24 = arith.constant 24 : index
    %c0_31 = arith.constant 0 : index
    %59 = vector.load %arg4[%c24, %c0_31] : memref<56x128xf32, #tpu.memory_space<vmem>>, vector<32x128xf32>
    %60 = arith.addf %58, %59 : vector<32x128xf32>
    %cst_32 = arith.constant 4.000000e-02 : f32
    %61 = vector.broadcast %cst_32 : f32 to vector<32x128xf32>
    %62 = arith.mulf %60, %61 : vector<32x128xf32>
    %c0_33 = arith.constant 0 : index
    %c0_34 = arith.constant 0 : index
    %63 = vector.load %arg3[%c0_33, %c0_34] : memref<32x128xf32, #tpu.memory_space<vmem>>, vector<32x128xf32>
    tpu.vector_store %arg3[%c0_33, %c0_34], %62 {strides = array<i32>} : memref<32x128xf32, #tpu.memory_space<vmem>>, vector<32x128xf32>,
    %64 = arith.subf %0, %62 : vector<32x128xf32>
    %c0_35 = arith.constant 0 : index
    %c0_36 = arith.constant 0 : index
    %65 = vector.load %arg2[%c0_35, %c0_36] : memref<32x128xf32, #tpu.memory_space<vmem>>, vector<32x128xf32>
    tpu.vector_store %arg2[%c0_35, %c0_36], %64 {strides = array<i32>} : memref<32x128xf32, #tpu.memory_space<vmem>>, vector<32x128xf32>,
    return
  }
  func.func @transform_0(%arg0: i32) -> (i32, i32) {
    %c0_i32 = arith.constant 0 : i32
    %c0_i32_0 = arith.constant 0 : i32
    return %c0_i32, %arg0 : i32, i32
  }
  func.func @transform_1(%arg0: i32) -> (i32, i32) {
    %c0_i32 = arith.constant 0 : i32
    %c0_i32_0 = arith.constant 0 : i32
    return %c0_i32, %arg0 : i32, i32
  }
  func.func @transform_2(%arg0: i32) -> (i32, i32) {
    %c0_i32 = arith.constant 0 : i32
    %c0_i32_0 = arith.constant 0 : i32
    return %c0_i32, %arg0 : i32, i32
  }
}

</mosaic_0001>

<bundles_post_ra>
// kernel: tpu_custom_call.1
= control target key start
LH: loop header
LB: loop body
LE: loop exit
PB: predicated region body
PF: predicated region fallthrough
CT: control target
= control target key end

     0   :  { %8 = vsyncpa [#allocation4], 0  ;;  %s505_s0 = inlined_call_operand.hbm [shape: f32[32,128], index: 0, kind: input, shape index: {}]   ;;  %s506_s1 = inlined_call_operand.hbm [shape: f32[32,128], index: 1, kind: output, shape index: {0}]   ;;  %s507_s2 = inlined_call_operand.hbm [shape: f32[32,128], index: 2, kind: output, shape index: {1}]  }
   0x1   :  { %9 = vsyncpa [#allocation5], 0 }
   0x2   :  { %10 = vsyncpa [#allocation8], 0  ;;  %s324_s9 = smov [#allocation3]   ;;  %s252_s13 = scalar_lea.hbm %s505_s0, 512 }
   0x3   :  { %s16_s10 = sshll.u32 %s324_s9, 4  ;;  %p253_p0 = scmp.ne.s32.totalorder %s505_s0, %s252_s13  ;;  %s17_s10 = int_to_ptr.vmem [resolvable:$true] %s16_s10 }
   0x4   :  { %p256_p1 = scmp.lt.u32.totalorder %s252_s13, %s505_s0 }
   0x6   :  { %p258_p2 = pnand %p256_p1, %p253_p0 }
   0x8   :  { %261 = shalt.err (!%p258_p2)
}
   0x9   :  { %s262_s18 = scalar_lea.vmem %s17_s10, 512  ;;  %p267_p4 = scmp.lt.s32.totalorder %s17_s10, %s17_s10 }
   0xa   :  { %p263_p3 = scmp.ne.s32.totalorder %s17_s10, %s262_s18  ;;  %p268_p5 = scmp.lt.s32.totalorder %s262_s18, %s262_s18 }
   0xc   :  { %p269_p6 = por %p268_p5, %p267_p4 }
   0xe   :  { %p270_p7 = pnand %p269_p6, %p263_p3 }
  0x10   :  { %273 = shalt.err (!%p270_p7)
}
  0x11   :  { %s325_s19 = smov 128   ;;  %s326_s20 = smov 8  }
  0x12   :  { %22 = dma.hbm_to_vmem [thread:$0]  %s505_s0, 512, %s17_s10, [#allocation4], %s325_s19, %s325_s19, %s326_s20  }
  0x13   :  { %318 = dma.done.wait [#allocation4], 512  }
  0x14   :  { %319 = vsyncadd [#allocation4], 4294966784  ;;  %v34_v0 = vlaneseq  ;;  %v359_v4 = vld [vmem:[#allocation3] sm:$0xff]  ;;  %v361_v5 = vld [vmem:[#allocation3 + $0x8] sm:$0xff]  ;;  %s327_s0 = smov [#allocation7]   ;;  %s328_s24 = smov [#allocation6]  }
  0x15   :  { %v363_v6 = vld [vmem:[#allocation3 + $0x10] sm:$0xff]  ;;  %30 = vst [vmem:[#allocation2 + $0xc] sm:$0xff] %v359_v4  ;;  %31 = vst [vmem:[#allocation2 + $0x14] sm:$0xff] %v361_v5  ;;  %v368_v7 = vld [vmem:[#allocation3 + $0x18] sm:$0xff]  ;;  %s231_s23 = sshll.u32 %s327_s0, 4  ;;  %s219_s25 = sshll.u32 %s328_s24, 4  ;;  %s232_s23 = int_to_ptr.vmem [resolvable:$true] %s231_s23  ;;  %s468_s25 = int_to_ptr.vmem [resolvable:$true] %s219_s25 }
  0x16   :  { %v35_v1 = vshrl.u32 %v34_v0, 7  ;;  %32 = vst [vmem:[#allocation2 + $0x1c] sm:$0xff] %v363_v6  ;;  %33 = vst [vmem:[#allocation2 + $0x24] sm:$0xff] %v368_v7  ;;  %s274_s26 = scalar_lea.vmem %s232_s23, 512  ;;  %p279_p9 = scmp.lt.s32.totalorder %s232_s23, %s232_s23 }
  0x17   :  { %p275_p8 = scmp.ne.s32.totalorder %s232_s23, %s274_s26  ;;  %p280_p10 = scmp.lt.s32.totalorder %s274_s26, %s274_s26 }
  0x18   :  { %v36_v2 = vsub.s32 0, %v35_v1  ;;  %v42_v3 = vsub.s32 7, %v35_v1 }
  0x19   :  { %p281_p11 = por %p280_p10, %p279_p9 }
  0x1a   :  { %v37_v8 = vrot.slane %v359_v4, %v36_v2  ;;  %v373_v9 = vrot.slane %v368_v7, %v42_v3 }
  0x1b   :  { %p282_p12 = pnand %p281_p11, %p275_p8 }
  0x1c   :  { %38 = vst [vmem:[#allocation2] sm:$0xff] %v37_v8  ;;  %39 = vst [vmem:[#allocation2 + $0x8] sm:$0xf] %v37_v8  ;;  %v377_v10 = vld [vmem:[#allocation2 + $0x10] sm:$0xff] }
  0x1d   :  { %44 = vst [vmem:[#allocation2 + $0x2c] sm:$0xff] %v373_v9  ;;  %45 = vst [vmem:[#allocation2 + $0x34] sm:$0xf] %v373_v9  ;;  %v379_v11 = vld [vmem:[#allocation2 + $0x11] sm:$0xff]  ;;  %v387_v15 = vld [vmem:[#allocation2 + $0x19] sm:$0xff] }
  0x1e   :  { %v381_v12 = vld [vmem:[#allocation2 + $0x12] sm:$0xff]  ;;  %v60_v13 = vadd.f32 %v379_v11, %v377_v10  ;;  %v391_v17 = vld [vmem:[#allocation2 + $0x1a] sm:$0xff] }
  0x1f   :  { %v385_v14 = vld [vmem:[#allocation2 + $0x18] sm:$0xff]  ;;  %v422_v60 = vld [vmem:[#allocation2 + $0x20] sm:$0xff]  ;;  %v87_v2 = vld [vmem:[#allocation2 + $0xd] sm:$0xff] }
  0x20   :  { %v61_v16 = vadd.f32 %v387_v15, %v385_v14  ;;  %v68_v18 = vadd.f32 %v381_v12, %v60_v13  ;;  %v394_v20 = vld [vmem:[#allocation2 + $0x13] sm:$0xff]  ;;  %v398_v28 = vld [vmem:[#allocation2 + $0x1b] sm:$0xff] }
  0x21   :  { %v402_v32 = vld [vmem:[#allocation2 + $0x15] sm:$0xff]  ;;  %v408_v40 = vld [vmem:[#allocation2 + $0x1d] sm:$0xff] }
  0x22   :  { %v69_v22 = vadd.f32 %v391_v17, %v61_v16  ;;  %v76_v23 = vadd.f32 %v394_v20, %v68_v18  ;;  %v406_v38 = vld [vmem:[#allocation2 + $0x16] sm:$0xff]  ;;  %v414_v46 = vld [vmem:[#allocation2 + $0x1e] sm:$0xff]  ;;  %v95_v18 = vld [vmem:[#allocation2 + $0xe] sm:$0xff] }
  0x23   :  { %v54_v19 = vld [vmem:[#allocation2 + $0x1] sm:$0xff]  ;;  %v55_v26 = vld [vmem:[#allocation2 + $0x9] sm:$0xff]  ;;  %v412_v44 = vld [vmem:[#allocation2 + $0x17] sm:$0xff] }
  0x24   :  { %v58_v21 = vadd.f32 %v54_v19, %v37_v8  ;;  %v62_v24 = vld [vmem:[#allocation2 + $0x2] sm:$0xff]  ;;  %v84_v29 = vadd.f32 %v76_v23, %v361_v5  ;;  %v77_v31 = vadd.f32 %v398_v28, %v69_v22  ;;  %v63_v47 = vld [vmem:[#allocation2 + $0xa] sm:$0xff] }
  0x25   :  { %v47_v25 = vld [vmem:[#allocation2 + $0x8] sm:$0xff]  ;;  %v418_v53 = vld [vmem:[#allocation2 + $0x1f] sm:$0xff] }
  0x26   :  { %v66_v27 = vadd.f32 %v62_v24, %v58_v21  ;;  %v70_v30 = vld [vmem:[#allocation2 + $0x3] sm:$0xff]  ;;  %v92_v34 = vadd.f32 %v402_v32, %v84_v29  ;;  %v59_v35 = vadd.f32 %v55_v26, %v47_v25  ;;  %v85_v37 = vadd.f32 %v77_v31, %v363_v6  ;;  %v71_v54 = vld [vmem:[#allocation2 + $0xb] sm:$0xff] }
  0x27   :  { %v78_v36 = vld [vmem:[#allocation2 + $0x4] sm:$0xff] }
  0x28   :  { %v74_v33 = vadd.f32 %v70_v30, %v66_v27  ;;  %v100_v41 = vadd.f32 %v406_v38, %v92_v34  ;;  %v86_v42 = vld [vmem:[#allocation2 + $0x5] sm:$0xff]  ;;  %v93_v43 = vadd.f32 %v408_v40, %v85_v37  ;;  %v67_v51 = vadd.f32 %v63_v47, %v59_v35  ;;  %v103_v27 = vld [vmem:[#allocation2 + $0xf] sm:$0xff] }
  0x29   :  { %v94_v49 = vld [vmem:[#allocation2 + $0x6] sm:$0xff] }
  0x2a   :  { %v82_v39 = vadd.f32 %v78_v36, %v74_v33  ;;  %v108_v48 = vadd.f32 %v412_v44, %v100_v41  ;;  %v101_v50 = vadd.f32 %v414_v46, %v93_v43  ;;  %v102_v56 = vld [vmem:[#allocation2 + $0x7] sm:$0xff]  ;;  %v75_v58 = vadd.f32 %v71_v54, %v67_v51 }
  0x2b   :  { %v115_v1 = vld [vmem:[#allocation2 + $0x21] sm:$0xff] }
  0x2c   :  { %v90_v45 = vadd.f32 %v86_v42, %v82_v39  ;;  %v113_v55 = vadd.f32 %v108_v48, %v385_v14  ;;  %v109_v57 = vadd.f32 %v418_v53, %v101_v50  ;;  %v83_v63 = vadd.f32 %v75_v58, %v359_v4  ;;  %v120_v16 = vld [vmem:[#allocation2 + $0x22] sm:$0xff] }
  0x2d   :  { %v125_v24 = vld [vmem:[#allocation2 + $0x23] sm:$0xff] }
  0x2e   :  { %v98_v52 = vadd.f32 %v94_v49, %v90_v45  ;;  %v114_v61 = vadd.f32 %v422_v60, %v109_v57  ;;  %v118_v62 = vadd.f32 %v113_v55, %v387_v15  ;;  %v91_v13 = vadd.f32 %v87_v2, %v83_v63  ;;  %v135_v37 = vld [vmem:[#allocation2 + $0x25] sm:$0xff] }
  0x2f   :  { %v140_v43 = vld [vmem:[#allocation2 + $0x26] sm:$0xff] }
  0x30   :  { %v106_v59 = vadd.f32 %v102_v56, %v98_v52  ;;  %v119_v3 = vadd.f32 %v115_v1, %v114_v61  ;;  %v123_v8 = vadd.f32 %v118_v62, %v391_v17  ;;  %v99_v23 = vadd.f32 %v95_v18, %v91_v13  ;;  %v145_v50 = vld [vmem:[#allocation2 + $0x27] sm:$0xff] }
  0x31   :  { %v150_v56 = vld [vmem:[#allocation2 + $0x28] sm:$0xff] }
  0x32   :  { %v111_v0 = vadd.f32 %v106_v59, %v47_v25  ;;  %v124_v21 = vadd.f32 %v120_v16, %v119_v3  ;;  %v128_v22 = vadd.f32 %v123_v8, %v398_v28  ;;  %v107_v25 = vadd.f32 %v103_v27, %v99_v23  ;;  %v155_v62 = vld [vmem:[#allocation2 + $0x29] sm:$0xff] }
  0x33   :  { %v160_v8 = vld [vmem:[#allocation2 + $0x2a] sm:$0xff] }
  0x34   :  { %v116_v19 = vadd.f32 %v111_v0, %v55_v26  ;;  %v129_v30 = vadd.f32 %v125_v24, %v124_v21  ;;  %v133_v31 = vadd.f32 %v128_v22, %v363_v6  ;;  %v112_v36 = vadd.f32 %v107_v25, %v377_v10  ;;  %v165_v22 = vld [vmem:[#allocation2 + $0x2b] sm:$0xff] }
  0x36   :  { %v121_v29 = vadd.f32 %v116_v19, %v63_v47  ;;  %v134_v34 = vadd.f32 %v129_v30, %v368_v7  ;;  %v138_v35 = vadd.f32 %v133_v31, %v408_v40  ;;  %v117_v42 = vadd.f32 %v112_v36, %v379_v11 }
  0x38   :  { %v126_v33 = vadd.f32 %v121_v29, %v71_v54  ;;  %v139_v39 = vadd.f32 %v135_v37, %v134_v34  ;;  %v143_v41 = vadd.f32 %v138_v35, %v414_v46  ;;  %v122_v49 = vadd.f32 %v117_v42, %v381_v12 }
  0x3a   :  { %v131_v26 = vadd.f32 %v126_v33, %v359_v4  ;;  %v144_v47 = vadd.f32 %v140_v43, %v139_v39  ;;  %v148_v48 = vadd.f32 %v143_v41, %v418_v53  ;;  %v127_v55 = vadd.f32 %v122_v49, %v394_v20 }
  0x3c   :  { %v136_v45 = vadd.f32 %v131_v26, %v87_v2  ;;  %v149_v52 = vadd.f32 %v145_v50, %v144_v47  ;;  %v153_v54 = vadd.f32 %v148_v48, %v422_v60  ;;  %v132_v61 = vadd.f32 %v127_v55, %v361_v5 }
  0x3e   :  { %v141_v51 = vadd.f32 %v136_v45, %v95_v18  ;;  %v154_v58 = vadd.f32 %v150_v56, %v149_v52  ;;  %v158_v59 = vadd.f32 %v153_v54, %v115_v1  ;;  %v137_v3 = vadd.f32 %v132_v61, %v402_v32  ;;  %v193_v45 = vld [vmem:[#allocation2 + $0x30] sm:$0xff] }
  0x40   :  { %v146_v57 = vadd.f32 %v141_v51, %v103_v27  ;;  %v159_v0 = vadd.f32 %v155_v62, %v154_v58  ;;  %v163_v2 = vadd.f32 %v158_v59, %v120_v16  ;;  %v142_v21 = vadd.f32 %v137_v3, %v406_v38 }
  0x42   :  { %v151_v63 = vadd.f32 %v146_v57, %v377_v10  ;;  %v164_v18 = vadd.f32 %v160_v8, %v159_v0  ;;  %v168_v19 = vadd.f32 %v163_v2, %v125_v24  ;;  %v147_v29 = vadd.f32 %v142_v21, %v412_v44 }
  0x44   :  { %v156_v13 = vadd.f32 %v151_v63, %v379_v11  ;;  %v173_v1 = vadd.f32 %v168_v19, %v368_v7  ;;  %v169_v27 = vadd.f32 %v165_v22, %v164_v18  ;;  %v152_v31 = vadd.f32 %v147_v29, %v385_v14  ;;  %v175_v11 = vld [vmem:[#allocation2 + $0x2d] sm:$0xff] }
  0x46   :  { %v161_v23 = vadd.f32 %v156_v13, %v381_v12  ;;  %v178_v16 = vadd.f32 %v173_v1, %v135_v37  ;;  %v174_v30 = vadd.f32 %v169_v27, %v373_v9  ;;  %v157_v34 = vadd.f32 %v152_v31, %v387_v15  ;;  %v180_v12 = vld [vmem:[#allocation2 + $0x2e] sm:$0xff] }
  0x48   :  { %v166_v10 = vadd.f32 %v161_v23, %v394_v20  ;;  %v183_v25 = vadd.f32 %v178_v16, %v140_v43  ;;  %v179_v33 = vadd.f32 %v175_v11, %v174_v30  ;;  %v162_v39 = vadd.f32 %v157_v34, %v391_v17  ;;  %v185_v20 = vld [vmem:[#allocation2 + $0x2f] sm:$0xff] }
  0x4a   :  { %v171_v24 = vadd.f32 %v166_v10, %v361_v5  ;;  %v188_v36 = vadd.f32 %v183_v25, %v145_v50  ;;  %v184_v26 = vadd.f32 %v180_v12, %v179_v33  ;;  %v167_v42 = vadd.f32 %v162_v39, %v398_v28 }
  0x4c   :  { %v176_v35 = vadd.f32 %v171_v24, %v402_v32  ;;  %v196_v9 = vadd.f32 %v188_v36, %v150_v56  ;;  %v189_v41 = vadd.f32 %v185_v20, %v184_v26  ;;  %v172_v15 = vadd.f32 %v167_v42, %v363_v6 }
  0x4e   :  { %v181_v37 = vadd.f32 %v176_v35, %v406_v38  ;;  %v200_v47 = vmul.f32 0.04, %v196_v9  ;;  %v197_v48 = vadd.f32 %v193_v45, %v189_v41  ;;  %v177_v17 = vadd.f32 %v172_v15, %v408_v40 }
  0x50   :  { %v186_v43 = vadd.f32 %v181_v37, %v412_v44  ;;  %204 = vst [vmem:[#allocation7 + $0x10] sm:$0xff] %v200_v47  ;;  %v201_v49 = vmul.f32 0.04, %v197_v48  ;;  %v208_v50 = vsub.f32 %v363_v6, %v200_v47  ;;  %v182_v51 = vadd.f32 %v177_v17, %v414_v46 }
  0x52   :  { %v194_v32 = vadd.f32 %v186_v43, %v385_v14  ;;  %205 = vst [vmem:[#allocation7 + $0x18] sm:$0xff] %v201_v49  ;;  %212 = vst [vmem:[#allocation6 + $0x10] sm:$0xff] %v208_v50  ;;  %v209_v28 = vsub.f32 %v368_v7, %v201_v49  ;;  %v187_v52 = vadd.f32 %v182_v51, %v418_v53 }
  0x54   :  { %v198_v38 = vmul.f32 0.04, %v194_v32  ;;  %213 = vst [vmem:[#allocation6 + $0x18] sm:$0xff] %v209_v28  ;;  %v195_v14 = vadd.f32 %v187_v52, %v422_v60 }
  0x56   :  { %202 = vst [vmem:[#allocation7] sm:$0xff] %v198_v38  ;;  %v206_v44 = vsub.f32 %v359_v4, %v198_v38  ;;  %v199_v6 = vmul.f32 0.04, %v195_v14 }
  0x58   :  { %210 = vst [vmem:[#allocation6] sm:$0xff] %v206_v44  ;;  %203 = vst [vmem:[#allocation7 + $0x8] sm:$0xff] %v199_v6  ;;  %v207_v40 = vsub.f32 %v361_v5, %v199_v6 }
  0x59   :  { %285 = shalt.err (!%p282_p12)
}
  0x5a   :  { %s286_s29 = scalar_lea.hbm %s507_s2, 512 }
  0x5b   :  { %p287_p13 = scmp.ne.s32.totalorder %s507_s2, %s286_s29  ;;  %p290_p0 = scmp.lt.u32.totalorder %s286_s29, %s507_s2 }
  0x5d   :  { %p292_p1 = pnand %p290_p0, %p287_p13 }
  0x5f   :  { %295 = shalt.err (!%p292_p1)
}
  0x60   :  { %237 = dma.vmem_to_hbm [thread:$0]  %s232_s23, 512, %s507_s2, [#allocation8], %s325_s19, %s325_s19, %s326_s20   ;;  %211 = vst [vmem:[#allocation6 + $0x8] sm:$0xff] %v207_v40 }
  0x61   :  { %s296_s8 = scalar_lea.vmem %s468_s25, 512  ;;  %p301_p3 = scmp.lt.s32.totalorder %s468_s25, %s468_s25 }
  0x62   :  { %p297_p2 = scmp.ne.s32.totalorder %s468_s25, %s296_s8  ;;  %p302_p4 = scmp.lt.s32.totalorder %s296_s8, %s296_s8 }
  0x64   :  { %p303_p5 = por %p302_p4, %p301_p3 }
  0x66   :  { %p304_p6 = pnand %p303_p5, %p297_p2 }
  0x68   :  { %307 = shalt.err (!%p304_p6)
}
  0x69   :  { %s308_s11 = scalar_lea.hbm %s506_s1, 512 }
  0x6a   :  { %p309_p7 = scmp.ne.s32.totalorder %s506_s1, %s308_s11  ;;  %p312_p8 = scmp.lt.u32.totalorder %s308_s11, %s506_s1 }
  0x6c   :  { %p314_p9 = pnand %p312_p8, %p309_p7 }
  0x6e   :  { %317 = shalt.err (!%p314_p9)
}
  0x6f   :  { %225 = dma.vmem_to_hbm [thread:$0]  %s468_s25, 512, %s506_s1, [#allocation5], %s325_s19, %s325_s19, %s326_s20  }
  0x70   :  { %320 = dma.done.wait [#allocation5], 512  }
  0x71   :  { %321 = vsyncadd [#allocation5], 4294966784 }
  0x72   :  { %322 = dma.done.wait [#allocation8], 512  }
  0x73   :  { %323 = vsyncadd [#allocation8], 4294966784 }
  0x74   :  { %244 = vsyncpa [#allocation4], 1 }
  0x75   :  { %245 = vsyncpa [#allocation5], 1 }
  0x76   :  { %246 = vsyncpa [#allocation8], 1 }

</bundles_post_ra>
